<compile_context>
chip_gen: v6e
topology: v6e:2x2x1
jax: 0.10.0
libtpu: 0.0.40
codegen_flags: <defaults>
</compile_context>

<pallas_src>
import jax
import jax.numpy as jnp
from jax.experimental import pallas as pl
from jax.experimental.pallas import tpu as pltpu

H1, H2, H3 = 128, 64, 64


def _mlp_kernel(x_ref, w1_ref, b1_ref, w2_ref, b2_ref, w3_ref, b3_ref,
                w4t_ref, b4_ref, out_ref, hidden_ref):
    # features: Linear(input_dim, 128) + ReLU   (Dropout(0.3) = identity at eval)
    x = x_ref[...]
    h1 = jnp.dot(x, w1_ref[...], preferred_element_type=jnp.float32) + b1_ref[...]
    h1 = jnp.maximum(h1, 0.0)

    # Linear(128, 64) + ReLU   (Dropout(0.2) = identity at eval)
    h2 = jnp.dot(h1.astype(w2_ref.dtype), w2_ref[...],
                 preferred_element_type=jnp.float32) + b2_ref[...]
    h2 = jnp.maximum(h2, 0.0)

    # Linear(64, 64) + ReLU  -> hidden_reps
    h3 = jnp.dot(h2.astype(w3_ref.dtype), w3_ref[...],
                 preferred_element_type=jnp.float32) + b3_ref[...]
    h3 = jnp.maximum(h3, 0.0)
    hidden_ref[...] = h3.astype(hidden_ref.dtype)

    # classifier: Linear(64, 1) + Sigmoid, computed lane-dense:
    #   (1,64) @ (64,TB) -> (1,TB)  (batch lives on the lane axis of the output block),
    # so the HBM writeback of the logits is unmasked/full-width instead of 1-lane masked stores.
    h3_t = h3.T.astype(w4t_ref.dtype)            # (TB,64) -> (64,TB) relayout on the idle XLU
    logit = jnp.dot(w4t_ref[...], h3_t, preferred_element_type=jnp.float32) + b4_ref[...]
    out_ref[...] = jax.nn.sigmoid(logit).astype(out_ref.dtype)


def _round_up(n, m):
    return ((n + m - 1) // m) * m


def _pick_batch_tile(B, input_dim, x_itemsize, vmem_budget, block_batch):
    """Largest lane-dense batch tile that fits the VMEM budget.

    Invariant needed by the lane-dense output block (1, TB): TB is either a multiple of 128
    (multi-step grid) or equal to the padded batch (single-step grid). Also guarantees >=2 grid
    steps when the batch is big enough so both v7x TensorCores get work via the parallel axis.
    """
    B8 = _round_up(B, 8)
    if B8 < 256:
        return B8                                    # single tile; blocks == full array dims
    block_batch = max(128, (block_batch // 128) * 128)
    in_pad = _round_up(input_dim, 128)
    # resident weights/biases (double-buffered by the default pipeliner), counted at 4 B/elem
    weight_bytes = 2 * 4 * (in_pad * H1 + H1 + H1 * H2 + H2 + H2 * H3 + H3 + H3 + 1)
    per_row = (2 * in_pad * x_itemsize               # x tile, double buffered
               + 2 * (H3 + 8) * 4                    # hidden + lane-dense out, double buffered
               + (H1 + H2 + H3) * 4)                 # live f32 intermediates
    avail = int(vmem_budget * 0.75) - weight_bytes
    tb = max(128, (avail // per_row) // 128 * 128)
    tb = min(tb, block_batch, _round_up(pl.cdiv(B8, 2), 128))   # >= 2 grid steps
    return tb


def baseline_model_forward(x, params, *, block_batch=1024, compute_dtype=None):
    """x: (B, input_dim). params: dict of weights/biases.
    Returns (out (B,1), hidden_reps (B,64)) — matching the PyTorch forward.
    compute_dtype=jnp.bfloat16 streams x/weights in bf16 (~2x at the HBM roofline);
    default keeps float32 for bit-level parity with the reference."""
    B, input_dim = x.shape
    cdt = jnp.dtype(compute_dtype) if compute_dtype is not None else x.dtype

    w1, b1 = params["w1"].astype(cdt), params["b1"]
    w2, b2 = params["w2"].astype(cdt), params["b2"]
    w3, b3 = params["w3"].astype(cdt), params["b3"]
    b4 = params["b4"]
    # (64, 1) -> (1, 64) row for the lane-dense head (wrapper-side reshape, no in-kernel cost).
    w4t = params["w4"].reshape(1, H3).astype(cdt)
    x = x.astype(cdt)

    # Per-generation VMEM budget. Physical: 128 MiB (v5e/v6e), 64 MiB per TC (v7x); default
    # scoped limit is only 16/32 MiB. Use half of physical and raise the scoped limit to match.
    try:
        vmem_phys = int(pltpu.get_tpu_info().vmem_capacity_bytes)
    except Exception:
        vmem_phys = 64 << 20                         # conservative fallback (v7x-sized)
    vmem_limit = min(vmem_phys, 128 << 20) // 2

    TB = _pick_batch_tile(B, input_dim, jnp.dtype(cdt).itemsize, vmem_limit, block_batch)
    B_pad = _round_up(B, TB)
    if B_pad != B:
        x = jnp.pad(x, ((0, B_pad - B), (0, 0)))
    grid = (B_pad // TB,)

    const = lambda a: pl.BlockSpec(a.shape, lambda i: (0, 0))   # resident across grid steps

    weight_bytes = sum(int(a.size) * a.dtype.itemsize
                       for a in (w1, b1, w2, b2, w3, b3, w4t, b4))
    cost = pl.CostEstimate(
        flops=2 * B_pad * (input_dim * H1 + H1 * H2 + H2 * H3 + H3),
        transcendentals=B_pad,
        bytes_accessed=int(x.dtype.itemsize) * B_pad * input_dim
                       + 4 * B_pad * (H3 + 1) + weight_bytes,
    )

    out, hidden = pl.pallas_call(
        _mlp_kernel,
        grid=grid,
        in_specs=[
            pl.BlockSpec((TB, input_dim), lambda i: (i, 0)),
            const(w1), const(b1),
            const(w2), const(b2),
            const(w3), const(b3),
            const(w4t), const(b4),
        ],
        out_specs=[
            # Lane-dense logits: batch on the lane axis -> unmasked 128-wide stores.
            pl.BlockSpec((1, TB), lambda i: (0, i)),
            # hidden_reps kept (TB, 64); last dim == full array dim. (A 128-wide slab re-layout
            # is a possible further v5e store-slot optimization, not needed for correctness.)
            pl.BlockSpec((TB, H3), lambda i: (i, 0)),
        ],
        out_shape=[
            jax.ShapeDtypeStruct((1, B_pad), jnp.float32),
            jax.ShapeDtypeStruct((B_pad, H3), jnp.float32),
        ],
        compiler_params=pltpu.CompilerParams(
            dimension_semantics=("parallel",),
            vmem_limit_bytes=int(vmem_limit)),
        cost_estimate=cost,
    )(x, w1, b1, w2, b2, w3, b3, w4t, b4)

    out = out[0, :B][:, None]          # (1, B_pad) -> (B, 1)
    hidden = hidden[:B]
    return out, hidden


def init_params(input_dim, key):
    """Deterministic synthetic parameters (shapes match the nn.Module __init__)."""
    ks = jax.random.split(key, 8)

    def lin(kw, kb, fan_in, fan_out):
        # Uniform(-1/sqrt(fan_in), 1/sqrt(fan_in)) like PyTorch's default Linear init.
        bound = 1.0 / jnp.sqrt(jnp.float32(fan_in))
        w = jax.random.uniform(kw, (fan_in, fan_out), jnp.float32, -bound, bound)
        b = jax.random.uniform(kb, (1, fan_out), jnp.float32, -bound, bound)
        return w, b

    w1, b1 = lin(ks[0], ks[1], input_dim, H1)
    w2, b2 = lin(ks[2], ks[3], H1, H2)
    w3, b3 = lin(ks[4], ks[5], H2, H3)
    w4, b4 = lin(ks[6], ks[7], H3, 1)
    return dict(w1=w1, b1=b1, w2=w2, b2=b2, w3=w3, b3=b3, w4=w4, b4=b4)


def _ref(x, p):
    h = jnp.maximum(x @ p["w1"] + p["b1"], 0.0)
    h = jnp.maximum(h @ p["w2"] + p["b2"], 0.0)
    h = jnp.maximum(h @ p["w3"] + p["b3"], 0.0)
    o = jax.nn.sigmoid(h @ p["w4"] + p["b4"])
    return o, h


if __name__ == "__main__":
    key = jax.random.PRNGKey(0)
    k_x, k_p, k_x2, k_x3 = jax.random.split(key, 4)

    input_dim = 32
    params = init_params(input_dim, k_p)

    def run_and_check(batch, k, atol=1e-5, rtol=1e-5, **kw):
        xv = jax.random.normal(k, (batch, input_dim), dtype=jnp.float32)
        out, hidden = baseline_model_forward(xv, params, **kw)
        jax.block_until_ready((out, hidden))
        o_ref, h_ref = _ref(xv, params)
        assert out.shape == (batch, 1) and hidden.shape == (batch, H3)
        assert jnp.allclose(out, o_ref, atol=atol, rtol=rtol)
        assert jnp.allclose(hidden, h_ref, atol=atol, rtol=rtol)
        return xv

    # Small, tile-aligned batch (single grid step, lane-dense (1, B) output).
    run_and_check(8, k_x)

    # Non-multiple-of-8 batch (exercises padding, single tile).
    run_and_check(20, k_x2)

    # Batch large enough for a multi-step grid: TB=256, B_pad=512, grid=(2,) — exercises padding,
    # the lane-dense (1, TB) output tiling and the parallel (megacore) batch axis.
    x3 = run_and_check(300, k_x3)

    # bf16 streaming path (memory-roofline option); loose tolerance vs. the f32 reference.
    out_b, hid_b = baseline_model_forward(x3, params, compute_dtype=jnp.bfloat16)
    jax.block_until_ready((out_b, hid_b))
    o_ref3, _ = _ref(x3, params)
    assert out_b.shape == (300, 1) and hid_b.shape == (300, H3)
    assert jnp.allclose(out_b, o_ref3, atol=5e-2, rtol=0.0)

    print("KERNEL_OK")
</pallas_src>

<mosaic_0001>
module attributes {stable_mosaic.version = 11 : i64} {
  func.func @_mlp_kernel(%arg0: i32, %arg1: memref<8x32xf32, #tpu.memory_space<vmem>>, %arg2: memref<32x128xf32, #tpu.memory_space<vmem>>, %arg3: memref<1x128xf32, #tpu.memory_space<vmem>>, %arg4: memref<128x64xf32, #tpu.memory_space<vmem>>, %arg5: memref<1x64xf32, #tpu.memory_space<vmem>>, %arg6: memref<64x64xf32, #tpu.memory_space<vmem>>, %arg7: memref<1x64xf32, #tpu.memory_space<vmem>>, %arg8: memref<1x64xf32, #tpu.memory_space<vmem>>, %arg9: memref<1x1xf32, #tpu.memory_space<vmem>>, %arg10: memref<1x8xf32, #tpu.memory_space<vmem>>, %arg11: memref<8x64xf32, #tpu.memory_space<vmem>>) attributes {dimension_semantics = [#tpu.dimension_semantics<parallel>], iteration_bounds = array<i64: 1>, scalar_prefetch = 0 : i64, scratch_operands = 0 : i64, tpu.core_type = #tpu.core_type<tc>, window_params = [{transform_indices = @transform_0, window_bounds = array<i64: 8, 32>}, {pipeline_mode = #tpu.pipeline_mode<synchronous>, transform_indices = @transform_1, window_bounds = array<i64: 32, 128>}, {pipeline_mode = #tpu.pipeline_mode<synchronous>, transform_indices = @transform_2, window_bounds = array<i64: 1, 128>}, {pipeline_mode = #tpu.pipeline_mode<synchronous>, transform_indices = @transform_3, window_bounds = array<i64: 128, 64>}, {pipeline_mode = #tpu.pipeline_mode<synchronous>, transform_indices = @transform_4, window_bounds = array<i64: 1, 64>}, {pipeline_mode = #tpu.pipeline_mode<synchronous>, transform_indices = @transform_5, window_bounds = array<i64: 64, 64>}, {pipeline_mode = #tpu.pipeline_mode<synchronous>, transform_indices = @transform_6, window_bounds = array<i64: 1, 64>}, {pipeline_mode = #tpu.pipeline_mode<synchronous>, transform_indices = @transform_7, window_bounds = array<i64: 1, 64>}, {pipeline_mode = #tpu.pipeline_mode<synchronous>, transform_indices = @transform_8, window_bounds = array<i64: 1, 1>}, {transform_indices = @transform_9, window_bounds = array<i64: 1, 8>}, {transform_indices = @transform_10, window_bounds = array<i64: 8, 64>}]} {
    %c0 = arith.constant 0 : index
    %c0_0 = arith.constant 0 : index
    %0 = vector.load %arg1[%c0, %c0_0] : memref<8x32xf32, #tpu.memory_space<vmem>>, vector<8x32xf32>
    %c0_1 = arith.constant 0 : index
    %c0_2 = arith.constant 0 : index
    %1 = vector.load %arg2[%c0_1, %c0_2] : memref<32x128xf32, #tpu.memory_space<vmem>>, vector<32x128xf32>
    %cst = arith.constant dense<0.000000e+00> : vector<8x128xf32>
    %2 = tpu.matmul %0, %1, %cst {dimension_numbers = #tpu.dot_dimension_numbers<[1], [0], [0], [1], [0, 0, 1, 1], [], []>} : vector<8x32xf32>, vector<32x128xf32>, vector<8x128xf32> -> vector<8x128xf32>
    %c0_3 = arith.constant 0 : index
    %c0_4 = arith.constant 0 : index
    %3 = vector.load %arg3[%c0_3, %c0_4] : memref<1x128xf32, #tpu.memory_space<vmem>>, vector<1x128xf32>
    %4 = vector.broadcast %3 : vector<1x128xf32> to vector<8x128xf32>
    %5 = arith.addf %2, %4 : vector<8x128xf32>
    %cst_5 = arith.constant 0.000000e+00 : f32
    %6 = vector.broadcast %cst_5 : f32 to vector<8x128xf32>
    %7 = arith.maximumf %5, %6 : vector<8x128xf32>
    %c0_6 = arith.constant 0 : index
    %c0_7 = arith.constant 0 : index
    %8 = vector.load %arg4[%c0_6, %c0_7] : memref<128x64xf32, #tpu.memory_space<vmem>>, vector<128x64xf32>
    %cst_8 = arith.constant dense<0.000000e+00> : vector<8x64xf32>
    %9 = tpu.matmul %7, %8, %cst_8 {dimension_numbers = #tpu.dot_dimension_numbers<[1], [0], [0], [1], [0, 0, 1, 1], [], []>} : vector<8x128xf32>, vector<128x64xf32>, vector<8x64xf32> -> vector<8x64xf32>
    %c0_9 = arith.constant 0 : index
    %c0_10 = arith.constant 0 : index
    %10 = vector.load %arg5[%c0_9, %c0_10] : memref<1x64xf32, #tpu.memory_space<vmem>>, vector<1x64xf32>
    %11 = vector.broadcast %10 : vector<1x64xf32> to vector<8x64xf32>
    %12 = arith.addf %9, %11 : vector<8x64xf32>
    %cst_11 = arith.constant 0.000000e+00 : f32
    %13 = vector.broadcast %cst_11 : f32 to vector<8x64xf32>
    %14 = arith.maximumf %12, %13 : vector<8x64xf32>
    %c0_12 = arith.constant 0 : index
    %c0_13 = arith.constant 0 : index
    %15 = vector.load %arg6[%c0_12, %c0_13] : memref<64x64xf32, #tpu.memory_space<vmem>>, vector<64x64xf32>
    %cst_14 = arith.constant dense<0.000000e+00> : vector<8x64xf32>
    %16 = tpu.matmul %14, %15, %cst_14 {dimension_numbers = #tpu.dot_dimension_numbers<[1], [0], [0], [1], [0, 0, 1, 1], [], []>} : vector<8x64xf32>, vector<64x64xf32>, vector<8x64xf32> -> vector<8x64xf32>
    %c0_15 = arith.constant 0 : index
    %c0_16 = arith.constant 0 : index
    %17 = vector.load %arg7[%c0_15, %c0_16] : memref<1x64xf32, #tpu.memory_space<vmem>>, vector<1x64xf32>
    %18 = vector.broadcast %17 : vector<1x64xf32> to vector<8x64xf32>
    %19 = arith.addf %16, %18 : vector<8x64xf32>
    %cst_17 = arith.constant 0.000000e+00 : f32
    %20 = vector.broadcast %cst_17 : f32 to vector<8x64xf32>
    %21 = arith.maximumf %19, %20 : vector<8x64xf32>
    %c0_18 = arith.constant 0 : index
    %c0_19 = arith.constant 0 : index
    %22 = vector.load %arg11[%c0_18, %c0_19] : memref<8x64xf32, #tpu.memory_space<vmem>>, vector<8x64xf32>
    tpu.vector_store %arg11[%c0_18, %c0_19], %21 {strides = array<i32>} : memref<8x64xf32, #tpu.memory_space<vmem>>, vector<8x64xf32>,
    %23 = tpu.transpose %21, [1, 0] : vector<8x64xf32> -> vector<64x8xf32>
    %c0_20 = arith.constant 0 : index
    %c0_21 = arith.constant 0 : index
    %24 = vector.load %arg8[%c0_20, %c0_21] : memref<1x64xf32, #tpu.memory_space<vmem>>, vector<1x64xf32>
    %cst_22 = arith.constant dense<0.000000e+00> : vector<1x8xf32>
    %25 = tpu.matmul %24, %23, %cst_22 {dimension_numbers = #tpu.dot_dimension_numbers<[1], [0], [0], [1], [0, 0, 1, 1], [], []>} : vector<1x64xf32>, vector<64x8xf32>, vector<1x8xf32> -> vector<1x8xf32>
    %c0_23 = arith.constant 0 : index
    %c0_24 = arith.constant 0 : index
    %26 = vector.load %arg9[%c0_23, %c0_24] : memref<1x1xf32, #tpu.memory_space<vmem>>, vector<1x1xf32>
    %27 = vector.broadcast %26 : vector<1x1xf32> to vector<1x8xf32>
    %28 = arith.addf %25, %27 : vector<1x8xf32>
    %29 = arith.negf %28 : vector<1x8xf32>
    %30 = math.exp %29 : vector<1x8xf32>
    %cst_25 = arith.constant 1.000000e+00 : f32
    %31 = vector.broadcast %cst_25 : f32 to vector<1x8xf32>
    %32 = arith.addf %31, %30 : vector<1x8xf32>
    %33 = arith.divf %31, %32 : vector<1x8xf32>
    %c0_26 = arith.constant 0 : index
    %c0_27 = arith.constant 0 : index
    %34 = vector.load %arg10[%c0_26, %c0_27] : memref<1x8xf32, #tpu.memory_space<vmem>>, vector<1x8xf32>
    tpu.vector_store %arg10[%c0_26, %c0_27], %33 {strides = array<i32>} : memref<1x8xf32, #tpu.memory_space<vmem>>, vector<1x8xf32>,
    return
  }
  func.func @transform_0(%arg0: i32) -> (i32, i32) {
    %c0_i32 = arith.constant 0 : i32
    %c0_i32_0 = arith.constant 0 : i32
    return %arg0, %c0_i32 : i32, i32
  }
  func.func @transform_1(%arg0: i32) -> (i32, i32) {
    %c0_i32 = arith.constant 0 : i32
    %c0_i32_0 = arith.constant 0 : i32
    %c0_i32_1 = arith.constant 0 : i32
    return %c0_i32, %c0_i32_0 : i32, i32
  }
  func.func @transform_2(%arg0: i32) -> (i32, i32) {
    %c0_i32 = arith.constant 0 : i32
    %c0_i32_0 = arith.constant 0 : i32
    %c0_i32_1 = arith.constant 0 : i32
    return %c0_i32, %c0_i32_0 : i32, i32
  }
  func.func @transform_3(%arg0: i32) -> (i32, i32) {
    %c0_i32 = arith.constant 0 : i32
    %c0_i32_0 = arith.constant 0 : i32
    %c0_i32_1 = arith.constant 0 : i32
    return %c0_i32, %c0_i32_0 : i32, i32
  }
  func.func @transform_4(%arg0: i32) -> (i32, i32) {
    %c0_i32 = arith.constant 0 : i32
    %c0_i32_0 = arith.constant 0 : i32
    %c0_i32_1 = arith.constant 0 : i32
    return %c0_i32, %c0_i32_0 : i32, i32
  }
  func.func @transform_5(%arg0: i32) -> (i32, i32) {
    %c0_i32 = arith.constant 0 : i32
    %c0_i32_0 = arith.constant 0 : i32
    %c0_i32_1 = arith.constant 0 : i32
    return %c0_i32, %c0_i32_0 : i32, i32
  }
  func.func @transform_6(%arg0: i32) -> (i32, i32) {
    %c0_i32 = arith.constant 0 : i32
    %c0_i32_0 = arith.constant 0 : i32
    %c0_i32_1 = arith.constant 0 : i32
    return %c0_i32, %c0_i32_0 : i32, i32
  }
  func.func @transform_7(%arg0: i32) -> (i32, i32) {
    %c0_i32 = arith.constant 0 : i32
    %c0_i32_0 = arith.constant 0 : i32
    %c0_i32_1 = arith.constant 0 : i32
    return %c0_i32, %c0_i32_0 : i32, i32
  }
  func.func @transform_8(%arg0: i32) -> (i32, i32) {
    %c0_i32 = arith.constant 0 : i32
    %c0_i32_0 = arith.constant 0 : i32
    %c0_i32_1 = arith.constant 0 : i32
    return %c0_i32, %c0_i32_0 : i32, i32
  }
  func.func @transform_9(%arg0: i32) -> (i32, i32) {
    %c0_i32 = arith.constant 0 : i32
    %c0_i32_0 = arith.constant 0 : i32
    return %c0_i32, %arg0 : i32, i32
  }
  func.func @transform_10(%arg0: i32) -> (i32, i32) {
    %c0_i32 = arith.constant 0 : i32
    %c0_i32_0 = arith.constant 0 : i32
    return %arg0, %c0_i32 : i32, i32
  }
}

</mosaic_0001>

<bundles_post_ra>
// kernel: tpu_custom_call.1
= control target key start
LH: loop header
LB: loop body
LE: loop exit
PB: predicated region body
PF: predicated region fallthrough
CT: control target
= control target key end

     0   :  { %s807_s0 = inlined_call_operand.vmem [shape: f32[8,32], index: 0, kind: input, shape index: {}]   ;;  %s808_s1 = inlined_call_operand.vmem [shape: f32[32,128], index: 1, kind: input, shape index: {}]   ;;  %s809_s2 = inlined_call_operand.vmem [shape: f32[1,128], index: 2, kind: input, shape index: {}]   ;;  %s810_s3 = inlined_call_operand.vmem [shape: f32[128,64], index: 3, kind: input, shape index: {}]   ;;  %s811_s4 = inlined_call_operand.vmem [shape: f32[1,64], index: 4, kind: input, shape index: {}]   ;;  %s812_s5 = inlined_call_operand.vmem [shape: f32[64,64], index: 5, kind: input, shape index: {}]   ;;  %s813_s6 = inlined_call_operand.vmem [shape: f32[1,64], index: 6, kind: input, shape index: {}]   ;;  %s814_s7 = inlined_call_operand.vmem [shape: f32[1,64], index: 7, kind: input, shape index: {}]   ;;  %s815_s8 = inlined_call_operand.<no memory space> [shape: f32[1,1], index: 8, kind: input, shape index: {}]   ;;  %s816_s9 = inlined_call_operand.hbm [shape: f32[1,8], index: 9, kind: output, shape index: {0}]   ;;  %s817_s10 = inlined_call_operand.hbm [shape: f32[8,64], index: 10, kind: output, shape index: {1}]  }
   0x1   :  { %v16_v0 = vstv %s815_s8 }
   0x2   :  { %17 = vst [vmem:[#allocation2] sm:$0x1] %v16_v0 }
   0x3   :  { %18 = vsyncpa [#allocation4], 0  ;;  %v42_v1 = vld [vmem:[%s808_s1 + $0x18] sm:$0xff]  ;;  %v598_v2 = vmov 0.0   ;;  %v41_v3 = vld [vmem:[%s808_s1 + $0x10] sm:$0xff]  ;;  %vm599_vm0 = vmmov 0  }
   0x4   :  { %474 = vmatprep.subr.mxu0 %v598_v2  ;;  %482 = vmatprep.mubr.msk.f32.mxu0 %vm599_vm0, %v598_v2  ;;  %v140_v4 = vld [vmem:[%s810_s3 + $0x78] sm:$0xff]  ;;  %v139_v5 = vld [vmem:[%s810_s3 + $0x70] sm:$0xff]  ;;  %v40_v6 = vld [vmem:[%s808_s1 + $0x8] sm:$0xff]  ;;  %vm50_vm1 = vcmask 261120  }
   0x5   :  { %475 = vmatpush3.msra.mxu0 %v42_v1  ;;  %485 = vmatprep.subr.mxu1 %v598_v2  ;;  %v138_v7 = vld [vmem:[%s810_s3 + $0x68] sm:$0xff]  ;;  %v39_v8 = vld [vmem:[%s808_s1] sm:$0xff] }
   0x6   :  { %476 = vmatprep.subr.mxu0 %v598_v2  ;;  %486 = vmatpush3.msra.mxu1 %v140_v4  ;;  %v38_v9 = vld [vmem:[%s807_s0] sm:$0xff] }
   0x7   :  { %477 = vmatpush3.msra.mxu0 %v41_v3  ;;  %487 = vmatprep.subr.mxu1 %v598_v2  ;;  %v137_v10 = vld [vmem:[%s810_s3 + $0x60] sm:$0xff] }
   0x8   :  { %478 = vmatprep.subr.mxu0 %v598_v2  ;;  %488 = vmatpush3.msra.mxu1 %v139_v5 }
   0x9   :  { %479 = vmatpush3.msra.mxu0 %v40_v6  ;;  %489 = vmatprep.subr.mxu1 %v598_v2 }
   0xa   :  { %19 = vsyncpa [#allocation6], 0  ;;  %480 = vmatprep.subr.mxu0 %v598_v2  ;;  %490 = vmatpush3.msra.mxu1 %v138_v7  ;;  %v136_v11 = vld [vmem:[%s810_s3 + $0x58] sm:$0xff]  ;;  %v135_v12 = vld [vmem:[%s810_s3 + $0x50] sm:$0xff]  ;;  %vm234_vm2 = vcmask 523264   ;;  %v600_v42 = vmov 0  }
   0xb   :  { %481 = vmatpush3.msra.mxu0 %v39_v8  ;;  %491 = vmatprep.subr.mxu1 %v598_v2  ;;  %v134_v13 = vld [vmem:[%s810_s3 + $0x48] sm:$0xff]  ;;  %v133_v14 = vld [vmem:[%s810_s3 + $0x40] sm:$0xff]  ;;  %v132_v15 = vld [vmem:[%s810_s3 + $0x38] sm:$0xff]  ;;  %s601_s30 = smov [#allocation5]  }
   0xc   :  { %483 = vmatmul.mubr.msk.f32.vlgmr.msra.gmra.mxu0 %vm50_vm1, %v38_v9  ;;  %492 = vmatpush3.msra.mxu1 %v137_v10  ;;  %v131_v16 = vld [vmem:[%s810_s3 + $0x30] sm:$0xff]  ;;  %v130_v17 = vld [vmem:[%s810_s3 + $0x28] sm:$0xff]  ;;  %v129_v18 = vld [vmem:[%s810_s3 + $0x20] sm:$0xff]  ;;  %s421_s11 = sshll.u32 %s601_s30, 4  ;;  %s422_s11 = int_to_ptr.vmem [resolvable:$true] %s421_s11 }
   0xd   :  { %493 = vmatprep.subr.mxu1 %v598_v2  ;;  %517 = vmatprep.mubr.msk.f32.mxu1 %vm599_vm0, %v598_v2  ;;  %v128_v19 = vld [vmem:[%s810_s3 + $0x18] sm:$0xff]  ;;  %v127_v20 = vld [vmem:[%s810_s3 + $0x10] sm:$0xff]  ;;  %v126_v21 = vld [vmem:[%s810_s3 + $0x8] sm:$0xff]  ;;  %s554_s1 = scalar_lea.vmem %s422_s11, 128  ;;  %p559_p1 = scmp.lt.s32.totalorder %s422_s11, %s422_s11 }
   0xe   :  { %494 = vmatpush3.msra.mxu1 %v136_v11  ;;  %520 = vmatprep.subr.mxu0 %v598_v2  ;;  %v125_v22 = vld [vmem:[%s810_s3] sm:$0xff]  ;;  %v226_v23 = vld [vmem:[%s812_s5 + $0x38] sm:$0xff]  ;;  %v225_v24 = vld [vmem:[%s812_s5 + $0x30] sm:$0xff]  ;;  %p555_p0 = scmp.ne.s32.totalorder %s422_s11, %s554_s1  ;;  %p560_p2 = scmp.lt.s32.totalorder %s554_s1, %s554_s1 }
   0xf   :  { %495 = vmatprep.subr.mxu1 %v598_v2  ;;  %536 = vmatprep.mubr.msk.f32.mxu0 %vm599_vm0, %v598_v2  ;;  %v224_v25 = vld [vmem:[%s812_s5 + $0x28] sm:$0xff]  ;;  %v223_v26 = vld [vmem:[%s812_s5 + $0x20] sm:$0xff]  ;;  %v222_v27 = vld [vmem:[%s812_s5 + $0x18] sm:$0xff] }
  0x10   :  { %496 = vmatpush3.msra.mxu1 %v135_v12  ;;  %521 = vmatpush3.msra.mxu0 %v226_v23  ;;  %v433_v28 = vld [vmem:[%s809_s2] ss:$0 sm:$0xff]  ;;  %v221_v33 = vld [vmem:[%s812_s5 + $0x10] sm:$0xff]  ;;  %v220_v34 = vld [vmem:[%s812_s5 + $0x8] sm:$0xff]  ;;  %p561_p3 = por %p560_p2, %p559_p1 }
  0x11   :  { %497 = vmatprep.subr.mxu1 %v598_v2  ;;  %522 = vmatprep.subr.mxu0 %v598_v2  ;;  %v219_v35 = vld [vmem:[%s812_s5] sm:$0xff] }
  0x12   :  { %498 = vmatpush3.msra.mxu1 %v134_v13  ;;  %523 = vmatpush3.msra.mxu0 %v225_v24  ;;  %v435_v36 = vld [vmem:[%s811_s4] ss:$0 sm:$0xff]  ;;  %p562_p4 = pnand %p561_p3, %p555_p0 }
  0x13   :  { %499 = vmatprep.subr.mxu1 %v598_v2  ;;  %524 = vmatprep.subr.mxu0 %v598_v2  ;;  %v311_v41 = vld [vmem:[#allocation2] sm:$0x1] }
  0x14   :  { %500 = vmatpush3.msra.mxu1 %v133_v14  ;;  %525 = vmatpush3.msra.mxu0 %v224_v25  ;;  %v436_v43 = vld [vmem:[%s813_s6] ss:$0 sm:$0xff] }
  0x15   :  { %501 = vmatprep.subr.mxu1 %v598_v2  ;;  %526 = vmatprep.subr.mxu0 %v598_v2  ;;  %v310_v48 = vld [vmem:[%s814_s7] sm:$0x1] }
  0x16   :  { %502 = vmatpush3.msra.mxu1 %v132_v15  ;;  %527 = vmatpush3.msra.mxu0 %v223_v26 }
  0x17   :  { %503 = vmatprep.subr.mxu1 %v598_v2  ;;  %528 = vmatprep.subr.mxu0 %v598_v2 }
  0x18   :  { %504 = vmatpush3.msra.mxu1 %v131_v16  ;;  %529 = vmatpush3.msra.mxu0 %v222_v27 }
  0x19   :  { %505 = vmatprep.subr.mxu1 %v598_v2  ;;  %530 = vmatprep.subr.mxu0 %v598_v2 }
  0x1a   :  { %506 = vmatpush3.msra.mxu1 %v130_v17  ;;  %531 = vmatpush3.msra.mxu0 %v221_v33 }
  0x1b   :  { %507 = vmatprep.subr.mxu1 %v598_v2  ;;  %532 = vmatprep.subr.mxu0 %v598_v2 }
  0x1c   :  { %508 = vmatpush3.msra.mxu1 %v129_v18  ;;  %533 = vmatpush3.msra.mxu0 %v220_v34 }
  0x1d   :  { %509 = vmatprep.subr.mxu1 %v598_v2  ;;  %534 = vmatprep.subr.mxu0 %v598_v2 }
  0x1e   :  { %510 = vmatpush3.msra.mxu1 %v128_v19  ;;  %535 = vmatpush3.msra.mxu0 %v219_v35 }
  0x1f   :  { %511 = vmatprep.subr.mxu1 %v598_v2  ;;  %539 = vmatprep.subr.mxu0 %v598_v2 }
  0x20   :  { %512 = vmatpush3.msra.mxu1 %v127_v20  ;;  %549 = vset.pattern.permute.xlu0 %v600_v42 }
  0x21   :  { %513 = vmatprep.subr.mxu1 %v598_v2  ;;  %314 = vperm.xlu0 %549, %v311_v41  }
  0x22   :  { %514 = vmatpush3.msra.mxu1 %v126_v21 }
  0x23   :  { %515 = vmatprep.subr.mxu1 %v598_v2 }
  0x24   :  { %516 = vmatpush3.msra.mxu1 %v125_v22 }
  0xcc   :  { %v120_v29 = vpop.f32.mrf.mxu0 }
  0xcd   :  { %v121_v30 = vadd.f32 %v433_v28, %v120_v29 }
  0xce   :  { %v484_v31 = vpop.f32.mrf.mxu0 }
  0xcf   :  { %v124_v32 = vmax.f32 %v121_v30, 0.0 }
  0xd1   :  { %518 = vmatmul.mubr.f32.vlgmr.msra.gmra.mxu1 %v124_v32 }
 0x191   :  { %v214_v37 = vpop.f32.mrf.mxu1 }
 0x192   :  { %v215_v38 = vadd.f32 %v435_v36, %v214_v37 }
 0x193   :  { %v519_v39 = vpop.f32.mrf.mxu1 }
 0x194   :  { %v218_v40 = vmax.f32 %v215_v38, 0.0 }
 0x196   :  { %537 = vmatmul.mubr.msk.f32.vlgmr.msra.gmra.mxu0 %vm234_vm2, %v218_v40 }
 0x197   :  { %541 = vmatprep.mubr.msk.f32.mxu0 %vm599_vm0, %v598_v2 }
 0x256   :  { %v304_v44 = vpop.f32.mrf.mxu0 }
 0x257   :  { %v305_v45 = vadd.f32 %v436_v43, %v304_v44 }
 0x258   :  { %v538_v46 = vpop.f32.mrf.mxu0 }
 0x259   :  { %v308_v47 = vmax.f32 %v305_v45, 0.0 }
 0x25b   :  { %309 = vst.msk [vmem:[#allocation5] sm:$0xff] %vm234_vm2, %v308_v47  ;;  %540 = vmatpush3.xpose.msk.msra.mxu0 %vm234_vm2, %v308_v47 }
 0x25e   :  { %542 = vmatmul.mubr.msk.f32.vlgmr.msra.gmra.mxu0 %vm234_vm2, %v310_v48 }
 0x25f   :  { %565 = shalt.err (!%p562_p4)
}
 0x260   :  { %424 = dma.vmem_to_hbm [thread:$0]  %s422_s11, 128, %s817_s10, [#allocation6]   ;;  %v317_v49 = vlaneseq  ;;  %v315_v52 = vpop.permute.xlu0 %314  ;;  %vm403_vm3 = vcmask 57344  }
 0x261   :  { %s602_s7 = smov [#allocation3]  }
 0x262   :  { %v318_v50 = vshrl.u32 %v317_v49, 7  ;;  %s411_s0 = sshll.u32 %s602_s7, 4  ;;  %s412_s0 = int_to_ptr.vmem [resolvable:$true] %s411_s0 }
 0x263   :  { %s574_s10 = scalar_lea.vmem %s412_s0, 16  ;;  %s578_s13 = scalar_lea.vmem %s412_s0, 32 }
 0x264   :  { %v319_v51 = vsub.s32 0, %v318_v50  ;;  %p575_p5 = scmp.ne.s32.totalorder %s412_s0, %s574_s10  ;;  %p579_p6 = scmp.lt.s32.totalorder %s412_s0, %s412_s0 }
 0x265   :  { %p580_p7 = scmp.lt.s32.totalorder %s578_s13, %s574_s10 }
 0x266   :  { %v320_v53 = vrot.slane %v315_v52, %v319_v51 }
 0x267   :  { %p581_p8 = por %p580_p7, %p579_p6 }
 0x269   :  { %p582_p9 = pnand %p581_p8, %p575_p5 }
 0x31e   :  { %v393_v54 = vpop.f32.mrf.mxu0 }
 0x31f   :  { %v394_v55 = vadd.f32 %v393_v54, %v320_v53 }
 0x320   :  { %v543_v56 = vpop.f32.mrf.mxu0 }
 0x321   :  { %v440_v57 = vmul.f32 -1.442695, %v394_v55 }
 0x323   :  { %550 = vpow2.f32 %v440_v57 }
 0x330   :  { %v551_v58 = vpop.eup %550 }
 0x331   :  { %v400_v59 = vadd.f32 1.0, %v551_v58 }
 0x333   :  { %552 = vrcp.f32 %v400_v59 }
 0x340   :  { %v553_v60 = vpop.eup %552 }
 0x341   :  { %404 = vst.msk [vmem:[#allocation3] sm:$0x1] %vm403_vm3, %v553_v60 }
 0x342   :  { %585 = shalt.err (!%p582_p9)
}
 0x343   :  { %414 = dma.vmem_to_hbm [thread:$0]  %s412_s0, 16, %s816_s9, [#allocation4]  }
 0x344   :  { %594 = dma.done.wait [#allocation4], 16  }
 0x345   :  { %595 = vsyncadd [#allocation4], 4294967280 }
 0x346   :  { %596 = dma.done.wait [#allocation6], 128  }
 0x347   :  { %597 = vsyncadd [#allocation6], 4294967168 }
 0x348   :  { %431 = vsyncpa [#allocation4], 1 }
 0x349   :  { %432 = vsyncpa [#allocation6], 1 }

</bundles_post_ra>
